<compile_context>
chip_gen: v5e
topology: v5e:2x2
jax: 0.10.0
libtpu: 0.0.40
codegen_flags: <defaults>
</compile_context>

<pallas_src>
import functools

import jax
import jax.numpy as jnp
from jax.experimental import pallas as pl
from jax.experimental.pallas import tpu as pltpu


def _points_loss_kernel(preds_ref, tfg_ref, tun_ref, out_ref, *, background_weight):
    """Partial sums for one (batch-tile, spatial-tile) grid point.

    preds_ref : [Bt, C, T]    predicted heatmaps (native dtype)
    tfg_ref   : [Bt, C, T]    foreground target channels (native dtype)
    tun_ref   : [Bt, 1, T]    "unsure / ignore" channel (native dtype)
    out_ref   : [Bt, 1, 2, C] f32 partials:
                  [:, 0, 0, :] = masked smooth-L1 sums over this spatial tile
                  [:, 0, 1, :] = per-class prediction sums over this spatial tile
    """
    p = preds_ref[...].astype(jnp.float32)          # [Bt, C, T]
    t = tfg_ref[...].astype(jnp.float32)            # [Bt, C, T]
    un = tun_ref[...].astype(jnp.float32)           # [Bt, 1, T]

    # element-wise smooth L1 (beta = 1.0, matching torch defaults)
    d = p - t
    ad = jnp.abs(d)
    sl1 = jnp.where(ad < 1.0, 0.5 * d * d, ad - 0.5)

    # Single multiplicative weight: 0 at "unsure" positions, background_weight
    # where every foreground target channel is exactly zero, 1 elsewhere.
    one = jnp.float32(1.0)
    if background_weight is None:
        w = jnp.where(un > 0.0, 0.0, one)                            # [Bt, 1, T]
    else:
        bg = jnp.max(jnp.abs(t), axis=1, keepdims=True) == 0.0       # [Bt, 1, T]
        w = jnp.where(un > 0.0, 0.0,
                      jnp.where(bg, jnp.float32(background_weight), one))
    sl1 = sl1 * w                                   # broadcast over channel dim

    loss_part = jnp.sum(sl1, axis=-1)               # [Bt, C]
    xsum_part = jnp.sum(p, axis=-1)                 # [Bt, C]

    # Pack both partials into the single tiny output block (one output DMA/step).
    bt, c = loss_part.shape
    sel = jax.lax.broadcasted_iota(jnp.int32, (bt, 1, 2, c), 2)
    out_ref[...] = jnp.where(sel == 0,
                             loss_part[:, None, None, :],
                             xsum_part[:, None, None, :])


def _pick_tiles(B, C, HW, itemsize, budget=1 << 20):
    """Pick (batch_tile, hw_tile) so one pipeline buffer of inputs stays ~<= budget."""
    bytes_per_pos = (2 * C + 1) * itemsize          # preds + fg targets + unsure
    if HW * bytes_per_pos <= budget or HW % 128 != 0:
        hw_tile = HW                                 # whole spatial extent per step
    else:
        hw_tile = 128
        for t in range(256, HW, 128):               # largest fitting 128-mult divisor
            if HW % t == 0 and t * bytes_per_pos <= budget:
                hw_tile = t
    per_sample = hw_tile * bytes_per_pos
    max_bt = max(1, budget // per_sample)
    bt = 1
    for d in range(1, B + 1):                        # largest divisor of B within budget
        if B % d == 0 and d <= max_bt:
            bt = d
    return bt, hw_tile


def points_loss(loc_preds, loc_targets, cls_images, background_weight=1.0):
    """JAX/Pallas equivalent of PointsLoss.forward.

    loc_preds   : [B, C, H, W]     float (any float dtype; kept native on the wire)
    loc_targets : [B, C+1, H, W]   float; channel 0 is the "unsure / ignore" channel
    cls_images  : [B]              int   (-1 => spatially supervised, else weak label)
    """
    if background_weight == 1:
        background_weight = None

    B, C, H, W = loc_preds.shape
    HW = H * W

    # Keep native dtype (no f32 materialization in HBM); cast happens in-kernel.
    p = loc_preds.reshape(B, C, HW)
    # Split targets so the kernel never slices at sublane offset 1.
    # TODO(synk): if the producer can emit targets with the unsure channel already
    # separated (or last), this one-time XLA slice-copy of loc_targets disappears.
    t = loc_targets.reshape(B, C + 1, HW)
    t_fg = t[:, 1:, :]
    t_un = t[:, :1, :]

    itemsize = jnp.dtype(loc_preds.dtype).itemsize
    bt, hw_tile = _pick_tiles(B, C, HW, itemsize)
    n_b = B // bt
    n_hw = HW // hw_tile

    kernel = functools.partial(_points_loss_kernel,
                               background_weight=background_weight)

    # Explicit VMEM budget: double-buffered input tiles + f32 intermediates headroom.
    in_buf_bytes = bt * (2 * C + 1) * hw_tile * itemsize
    vmem_est = 2 * in_buf_bytes + 8 * bt * C * hw_tile * 4 + (2 << 20)
    vmem_limit = int(min(max(vmem_est, 32 * 1024 * 1024), 100 * 1024 * 1024))

    partials = pl.pallas_call(
        kernel,
        out_shape=jax.ShapeDtypeStruct((B, n_hw, 2, C), jnp.float32),
        grid=(n_b, n_hw),
        in_specs=[
            pl.BlockSpec((bt, C, hw_tile), lambda bi, hi: (bi, 0, hi)),
            pl.BlockSpec((bt, C, hw_tile), lambda bi, hi: (bi, 0, hi)),
            pl.BlockSpec((bt, 1, hw_tile), lambda bi, hi: (bi, 0, hi)),
        ],
        out_specs=pl.BlockSpec((bt, 1, 2, C), lambda bi, hi: (bi, hi, 0, 0)),
        compiler_params=pltpu.CompilerParams(
            dimension_semantics=("parallel", "parallel"),
            vmem_limit_bytes=vmem_limit),
    )(p, t_fg, t_un)

    # ---------------- tiny finalize in plain JAX ----------------
    loss_sums = jnp.sum(partials[:, :, 0, :], axis=(1, 2))   # [B]   masked SL1 sum
    x_sum = jnp.sum(partials[:, :, 1, :], axis=1)            # [B,C] per-class pred sum

    cls_images = cls_images.astype(jnp.int32)

    # spatial branch (cls_images == -1): mean over all elements of valid samples
    valid_sp = cls_images == -1
    n_sp = jnp.sum(valid_sp.astype(jnp.float32))
    sp_sum = jnp.sum(jnp.where(valid_sp, loss_sums, 0.0))
    denom_sp = n_sp * float(C * HW)
    loss_spatial = jnp.where(n_sp > 0.0, sp_sum / jnp.maximum(denom_sp, 1.0), 0.0)

    # WSOD branch (cls_images != -1)
    valid_w = ~valid_sp
    n_w = jnp.sum(valid_w.astype(jnp.float32))
    y = cls_images
    pos = ((y > 0) & valid_w).astype(jnp.float32)
    # matches torch: y_target[b, y[b]] = 1 for y[b] > 0 (out-of-range labels -> zeros)
    y_target = jax.nn.one_hot(y, C, dtype=jnp.float32) * pos[:, None]

    dw = x_sum - y_target
    adw = jnp.abs(dw)
    lw = jnp.where(adw < 1.0, 0.5 * dw * dw, adw - 0.5)
    case_binary = (x_sum >= 1.0) & (y_target >= 1.0)
    lw = jnp.where(case_binary, 0.0, lw)
    lw = jnp.where(valid_w[:, None], lw, 0.0)
    denom_w = n_w * float(C)
    loss_wsod = jnp.where(n_w > 0.0, jnp.sum(lw) / jnp.maximum(denom_w, 1.0), 0.0)

    return (loss_spatial + loss_wsod) / 2.0


if __name__ == "__main__":
    key = jax.random.PRNGKey(0)
    B, C, H, W = 2, 4, 16, 16
    k1, k2 = jax.random.split(key)

    loc_preds = jax.random.normal(k1, (B, C, H, W), dtype=jnp.float32)
    # sparse 0/1 heatmap-style targets; channel 0 is the "unsure" channel
    loc_targets = (jax.random.uniform(k2, (B, C + 1, H, W)) > 0.8).astype(jnp.float32)
    # sample 0: spatially supervised (-1); sample 1: weak image label = class 2
    cls_images = jnp.array([-1, 2], dtype=jnp.int32)

    # path 1: f32 inputs, default background_weight (disabled)
    loss_a = points_loss(loc_preds, loc_targets, cls_images)
    jax.block_until_ready(loss_a)

    # path 2: bf16 inputs (native-dtype DMA, in-kernel cast) + background weighting
    loss_b = points_loss(loc_preds.astype(jnp.bfloat16),
                         loc_targets.astype(jnp.bfloat16),
                         cls_images, background_weight=0.5)
    jax.block_until_ready(loss_b)

    print("KERNEL_OK")
</pallas_src>

<mosaic_0001>
module attributes {stable_mosaic.version = 11 : i64} {
  func.func @_points_loss_kernel(%arg0: i32, %arg1: i32, %arg2: memref<2x4x256xf32, #tpu.memory_space<vmem>>, %arg3: memref<2x4x256xf32, #tpu.memory_space<vmem>>, %arg4: memref<2x1x256xf32, #tpu.memory_space<vmem>>, %arg5: memref<2x1x2x4xf32, #tpu.memory_space<vmem>>) attributes {dimension_semantics = [#tpu.dimension_semantics<parallel>, #tpu.dimension_semantics<parallel>], iteration_bounds = array<i64: 1, 1>, scalar_prefetch = 0 : i64, scratch_operands = 0 : i64, tpu.core_type = #tpu.core_type<tc>, window_params = [{transform_indices = @transform_0, window_bounds = array<i64: 2, 4, 256>}, {transform_indices = @transform_1, window_bounds = array<i64: 2, 4, 256>}, {transform_indices = @transform_2, window_bounds = array<i64: 2, 1, 256>}, {transform_indices = @transform_3, window_bounds = array<i64: 2, 1, 2, 4>}]} {
    %c0 = arith.constant 0 : index
    %c0_0 = arith.constant 0 : index
    %c0_1 = arith.constant 0 : index
    %0 = vector.load %arg2[%c0, %c0_0, %c0_1] : memref<2x4x256xf32, #tpu.memory_space<vmem>>, vector<2x4x256xf32>
    %c0_2 = arith.constant 0 : index
    %c0_3 = arith.constant 0 : index
    %c0_4 = arith.constant 0 : index
    %1 = vector.load %arg3[%c0_2, %c0_3, %c0_4] : memref<2x4x256xf32, #tpu.memory_space<vmem>>, vector<2x4x256xf32>
    %c0_5 = arith.constant 0 : index
    %c0_6 = arith.constant 0 : index
    %c0_7 = arith.constant 0 : index
    %2 = vector.load %arg4[%c0_5, %c0_6, %c0_7] : memref<2x1x256xf32, #tpu.memory_space<vmem>>, vector<2x1x256xf32>
    %3 = arith.subf %0, %1 : vector<2x4x256xf32>
    %4 = math.absf %3 : vector<2x4x256xf32>
    %cst = arith.constant 1.000000e+00 : f32
    %5 = vector.broadcast %cst : f32 to vector<2x4x256xf32>
    %6 = arith.cmpf olt, %4, %5 : vector<2x4x256xf32>
    %cst_8 = arith.constant 5.000000e-01 : f32
    %7 = vector.broadcast %cst_8 : f32 to vector<2x4x256xf32>
    %8 = arith.mulf %7, %3 : vector<2x4x256xf32>
    %9 = arith.mulf %8, %3 : vector<2x4x256xf32>
    %cst_9 = arith.constant 5.000000e-01 : f32
    %10 = vector.broadcast %cst_9 : f32 to vector<2x4x256xf32>
    %11 = arith.subf %4, %10 : vector<2x4x256xf32>
    %12 = arith.select %6, %9, %11 : vector<2x4x256xi1>, vector<2x4x256xf32>
    %cst_10 = arith.constant 0.000000e+00 : f32
    %13 = vector.broadcast %cst_10 : f32 to vector<2x1x256xf32>
    %14 = arith.cmpf ogt, %2, %13 : vector<2x1x256xf32>
    %cst_11 = arith.constant 0.000000e+00 : f32
    %cst_12 = arith.constant 1.000000e+00 : f32
    %15 = vector.broadcast %cst_11 : f32 to vector<2x1x256xf32>
    %16 = vector.broadcast %cst_12 : f32 to vector<2x1x256xf32>
    %17 = arith.select %14, %15, %16 : vector<2x1x256xi1>, vector<2x1x256xf32>
    %18 = vector.broadcast %17 : vector<2x1x256xf32> to vector<2x4x256xf32>
    %19 = arith.mulf %12, %18 : vector<2x4x256xf32>
    %cst_13 = arith.constant dense<0.000000e+00> : vector<2x4xf32>
    %20 = vector.multi_reduction <add>, %19, %cst_13 [2] : vector<2x4x256xf32> to vector<2x4xf32>
    %cst_14 = arith.constant dense<0.000000e+00> : vector<2x4xf32>
    %21 = vector.multi_reduction <add>, %0, %cst_14 [2] : vector<2x4x256xf32> to vector<2x4xf32>
    %22 = tpu.iota {dimensions = array<i32: 2>} : vector<2x1x2x4xi32>
    %c0_i32 = arith.constant 0 : i32
    %23 = vector.broadcast %c0_i32 : i32 to vector<2x1x2x4xi32>
    %24 = arith.cmpi eq, %22, %23 : vector<2x1x2x4xi32>
    %25 = vector.shape_cast %20 : vector<2x4xf32> to vector<2x1x1x4xf32>
    %26 = vector.shape_cast %21 : vector<2x4xf32> to vector<2x1x1x4xf32>
    %27 = vector.shape_cast %25 : vector<2x1x1x4xf32> to vector<2x1x1x4xf32>
    %28 = vector.broadcast %27 : vector<2x1x1x4xf32> to vector<2x1x2x4xf32>
    %29 = vector.shape_cast %26 : vector<2x1x1x4xf32> to vector<2x1x1x4xf32>
    %30 = vector.broadcast %29 : vector<2x1x1x4xf32> to vector<2x1x2x4xf32>
    %31 = arith.select %24, %28, %30 : vector<2x1x2x4xi1>, vector<2x1x2x4xf32>
    %c0_15 = arith.constant 0 : index
    %c0_16 = arith.constant 0 : index
    %c0_17 = arith.constant 0 : index
    %c0_18 = arith.constant 0 : index
    %32 = vector.load %arg5[%c0_15, %c0_16, %c0_17, %c0_18] : memref<2x1x2x4xf32, #tpu.memory_space<vmem>>, vector<2x1x2x4xf32>
    tpu.vector_store %arg5[%c0_15, %c0_16, %c0_17, %c0_18], %31 {strides = array<i32>} : memref<2x1x2x4xf32, #tpu.memory_space<vmem>>, vector<2x1x2x4xf32>,
    return
  }
  func.func @transform_0(%arg0: i32, %arg1: i32) -> (i32, i32, i32) {
    %c0_i32 = arith.constant 0 : i32
    %c0_i32_0 = arith.constant 0 : i32
    return %arg0, %c0_i32, %arg1 : i32, i32, i32
  }
  func.func @transform_1(%arg0: i32, %arg1: i32) -> (i32, i32, i32) {
    %c0_i32 = arith.constant 0 : i32
    %c0_i32_0 = arith.constant 0 : i32
    return %arg0, %c0_i32, %arg1 : i32, i32, i32
  }
  func.func @transform_2(%arg0: i32, %arg1: i32) -> (i32, i32, i32) {
    %c0_i32 = arith.constant 0 : i32
    %c0_i32_0 = arith.constant 0 : i32
    return %arg0, %c0_i32, %arg1 : i32, i32, i32
  }
  func.func @transform_3(%arg0: i32, %arg1: i32) -> (i32, i32, i32, i32) {
    %c0_i32 = arith.constant 0 : i32
    %c0_i32_0 = arith.constant 0 : i32
    %c0_i32_1 = arith.constant 0 : i32
    return %arg0, %arg1, %c0_i32, %c0_i32_0 : i32, i32, i32, i32
  }
}

</mosaic_0001>

<bundles_post_ra>
// kernel: tpu_custom_call.1
= control target key start
LH: loop header
LB: loop body
LE: loop exit
PB: predicated region body
PF: predicated region fallthrough
CT: control target
= control target key end

     0   :  { %8 = vsyncpa [#allocation3], 0  ;;  %s359_s0 = inlined_call_operand.hbm [shape: f32[2,4,256], index: 0, kind: input, shape index: {}]   ;;  %s360_s1 = inlined_call_operand.hbm [shape: f32[2,4,256], index: 1, kind: input, shape index: {}]   ;;  %s361_s2 = inlined_call_operand.hbm [shape: f32[2,1,256], index: 2, kind: input, shape index: {}]   ;;  %s362_s3 = inlined_call_operand.hbm [shape: f32[2,1,2,4], index: 3, kind: output, shape index: {}]  }
   0x1   :  { %9 = vsyncpa [#allocation6], 0 }
   0x2   :  { %10 = vsyncpa [#allocation4], 0  ;;  %s28_s14 = sshll.u32 %s360_s1, 4  ;;  %s302_s15 = smov [#allocation5]   ;;  %s29_s14 = int_to_ptr.hbm [resolvable:$true] %s28_s14 }
   0x3   :  { %s30_s16 = sshll.u32 %s302_s15, 4  ;;  %s15_s19 = sshll.u32 %s359_s0, 4  ;;  %s31_s16 = int_to_ptr.vmem [resolvable:$true] %s30_s16  ;;  %s16_s19 = int_to_ptr.hbm [resolvable:$true] %s15_s19 }
   0x4   :  { %s303_s20 = smov 128   ;;  %s304_s21 = smov 8  }
   0x5   :  { %36 = dma.hbm_to_vmem [thread:$0]  %s29_s14, 256, %s31_s16, [#allocation6], %s303_s20, %s303_s20, %s304_s21  }
   0x6   :  { %s305_s22 = smov [#allocation2]   ;;  %s41_s26 = sshll.u32 %s361_s2, 4  ;;  %s42_s26 = int_to_ptr.hbm [resolvable:$true] %s41_s26 }
   0x7   :  { %s17_s23 = sshll.u32 %s305_s22, 4  ;;  %s306_s1 = smov [#allocation7]   ;;  %s18_s23 = int_to_ptr.vmem [resolvable:$true] %s17_s23 }
   0x8   :  { %23 = dma.hbm_to_vmem [thread:$0]  %s16_s19, 256, %s18_s23, [#allocation3], %s303_s20, %s303_s20, %s304_s21  }
   0x9   :  { %s43_s27 = sshll.u32 %s306_s1, 4  ;;  %s307_s28 = smov 32   ;;  %s44_s27 = int_to_ptr.vmem [resolvable:$true] %s43_s27 }
   0xa   :  { %s308_s29 = smov 2  }
   0xb   :  { %49 = dma.hbm_to_vmem [thread:$0]  %s42_s26, 64, %s44_s27, [#allocation6], %s307_s28, %s307_s28, %s308_s29  }
   0xc   :  { %296 = dma.done.wait [#allocation3], 256  }
   0xd   :  { %297 = vsyncadd [#allocation3], 4294967040 }
   0xe   :  { %298 = dma.done.wait [#allocation6], 320  }
   0xf   :  { %299 = vsyncadd [#allocation6], 4294966976  ;;  %v62_v0 = vld [vmem:[#allocation2] sm:$0xff]  ;;  %v64_v1 = vld [vmem:[#allocation5] sm:$0xff]  ;;  %v309_v7 = vmov 1.0   ;;  %vm94_vm2 = vcmask 1043456   ;;  %v147_v51 = vlaneseq }
  0x10   :  { %v66_v2 = vld [vmem:[#allocation7] sm:$0x3]  ;;  %v68_v3 = vsub.f32 %v62_v0, %v64_v1  ;;  %v63_v4 = vld [vmem:[#allocation2 + $0x8] sm:$0xff]  ;;  %v65_v5 = vld [vmem:[#allocation5 + $0x8] sm:$0xff]  ;;  %vm166_vm6 = vcmask 25600   ;;  %s310_s0 = smov [#allocation8]  }
  0x11   :  { %vm82_vm0 = vcmp.gt.f32.partialorder %v66_v2, 0.0  ;;  %v67_v6 = vld [vmem:[#allocation7 + $0x2] sm:$0x3]  ;;  %v69_v9 = vsub.f32 %v63_v4, %v65_v5  ;;  %v153_v53 = vand.u32 127, %v147_v51  ;;  %v148_v54 = vshrl.u32 %v147_v51, 7  ;;  %s173_s2 = sshll.u32 %s310_s0, 4  ;;  %s174_s2 = int_to_ptr.vmem [resolvable:$true] %s173_s2 }
  0x12   :  { %v84_v8 = vsel %vm82_vm0, 0.0, %v309_v7  ;;  %vm83_vm1 = vcmp.gt.f32.partialorder %v67_v6, 0.0  ;;  %v70_v10 = vand.u32 2147483647, %v68_v3  ;;  %v74_v11 = vmul.f32 0.5, %v68_v3  ;;  %s175_s5 = sshll.u32 %s362_s3, 4  ;;  %s176_s5 = int_to_ptr.hbm [resolvable:$true] %s175_s5 }
  0x13   :  { %v88_v12 = vperm.slane %v84_v8, 0  ;;  %v89_v13 = vperm.slane %v84_v8, 1  ;;  %v71_v14 = vand.u32 2147483647, %v69_v9  ;;  %v75_v15 = vmul.f32 0.5, %v69_v9 }
  0x14   :  { %v85_v16 = vsel %vm83_vm1, 0.0, %v309_v7  ;;  %vm72_vm3 = vcmp.lt.f32.partialorder %v70_v10, 1.0  ;;  %v76_v17 = vmul.f32 %v74_v11, %v68_v3  ;;  %v189_v18 = vadd.f32 -0.5, %v70_v10 }
  0x15   :  { %v92_v19 = vrot.slane %v89_v13, 4  ;;  %vm73_vm4 = vcmp.lt.f32.partialorder %v71_v14, 1.0  ;;  %v77_v20 = vmul.f32 %v75_v15, %v69_v9  ;;  %v190_v21 = vadd.f32 -0.5, %v71_v14 }
  0x16   :  { %v80_v22 = vsel %vm72_vm3, %v76_v17, %v189_v18  ;;  %v90_v24 = vperm.slane %v85_v16, 0  ;;  %v91_v25 = vperm.slane %v85_v16, 1  ;;  %vm149_vm5 = vcmp.eq.s32.totalorder %v148_v54, 0 }
  0x17   :  { %v95_v23 = vsel %vm94_vm2, %v88_v12, %v92_v19  ;;  %v81_v27 = vsel %vm73_vm4, %v77_v20, %v190_v21 }
  0x18   :  { %v99_v26 = vmul.f32 %v95_v23, %v80_v22  ;;  %v93_v28 = vrot.slane %v91_v25, 4 }
  0x1a   :  { %103 = vst [vmem:[#allocation1] ss:$2 sm:$0xff] %v99_v26  ;;  %v96_v29 = vsel %vm94_vm2, %v90_v24, %v93_v28 }
  0x1b   :  { %v100_v30 = vmul.f32 %v96_v29, %v81_v27 }
  0x1d   :  { %107 = vst [vmem:[#allocation1 + $0x10] ss:$2 sm:$0xff] %v100_v30 }
  0x21   :  { %v104_v31 = vld.sshfl [vmem:[#allocation1] sm:$0xff pattern:$0x75316420]  ;;  %v105_v32 = vld.sshfl [vmem:[#allocation1 + $0x8] sm:$0xff pattern:$0x75316420] }
  0x22   :  { %126 = vst [vmem:[#allocation1] ss:$2 sm:$0xff] %v62_v0  ;;  %v114_v33 = vsel %vm94_vm2, %v104_v31, 0.0  ;;  %v115_v34 = vsel %vm94_vm2, %v105_v32, 0.0 }
  0x23   :  { %v116_v35 = vadd.f32 %v115_v34, %v114_v33 }
  0x24   :  { %v108_v36 = vld.sshfl [vmem:[#allocation1 + $0x10] sm:$0xff pattern:$0x75316420]  ;;  %v109_v37 = vld.sshfl [vmem:[#allocation1 + $0x18] sm:$0xff pattern:$0x75316420] }
  0x25   :  { %117 = vadd.xlane.f32.xlu0 %v116_v35  ;;  %130 = vst [vmem:[#allocation1 + $0x10] ss:$2 sm:$0xff] %v63_v4  ;;  %v119_v38 = vsel %vm94_vm2, %v108_v36, 0.0  ;;  %v120_v39 = vsel %vm94_vm2, %v109_v37, 0.0 }
  0x26   :  { %v121_v42 = vadd.f32 %v120_v39, %v119_v38 }
  0x29   :  { %v127_v40 = vld.sshfl [vmem:[#allocation1] sm:$0xff pattern:$0x75316420]  ;;  %v128_v41 = vld.sshfl [vmem:[#allocation1 + $0x8] sm:$0xff pattern:$0x75316420] }
  0x2a   :  { %v137_v43 = vsel %vm94_vm2, %v127_v40, 0.0  ;;  %v138_v44 = vsel %vm94_vm2, %v128_v41, 0.0 }
  0x2b   :  { %v139_v45 = vadd.f32 %v138_v44, %v137_v43 }
  0x2c   :  { %v131_v46 = vld.sshfl [vmem:[#allocation1 + $0x10] sm:$0xff pattern:$0x75316420]  ;;  %v132_v47 = vld.sshfl [vmem:[#allocation1 + $0x18] sm:$0xff pattern:$0x75316420] }
  0x2d   :  { %140 = vadd.xlane.f32.xlu1 %v139_v45  ;;  %122 = vadd.xlane.f32.xlu0 %v121_v42  ;;  %v142_v48 = vsel %vm94_vm2, %v131_v46, 0.0  ;;  %v143_v49 = vsel %vm94_vm2, %v132_v47, 0.0 }
  0x2e   :  { %v144_v50 = vadd.f32 %v143_v49, %v142_v48 }
  0x35   :  { %145 = vadd.xlane.f32.xlu1 %v144_v50 }
  0x98   :  { %v118_v52 = vpop.xlane.xlu0 %117 }
  0x99   :  { %v154_v55 = vperm.slane %v118_v52, %v153_v53 }
  0xa0   :  { %v141_v56 = vpop.xlane.xlu1 %140  ;;  %v123_v59 = vpop.xlane.xlu0 %122 }
  0xa1   :  { %v160_v57 = vperm.slane %v141_v56, %v153_v53  ;;  %v155_v60 = vperm.slane %v123_v59, %v153_v53 }
  0xa3   :  { %v164_v58 = vsel %vm149_vm5, %v154_v55, %v160_v57 }
  0xa4   :  { %167 = vst.msk [vmem:[#allocation8] sm:$0x3] %vm166_vm6, %v164_v58 }
  0xa8   :  { %v146_v61 = vpop.xlane.xlu1 %145 }
  0xa9   :  { %v161_v62 = vperm.slane %v146_v61, %v153_v53 }
  0xab   :  { %v165_v63 = vsel %vm149_vm5, %v155_v60, %v161_v62 }
  0xac   :  { %168 = vst.msk [vmem:[#allocation8 + $0x2] sm:$0x3] %vm166_vm6, %v165_v63 }
  0xad   :  { %181 = dma.vmem_to_hbm [thread:$0]  %s174_s2, 64, %s176_s5, [#allocation4], %s307_s28, %s307_s28, %s308_s29  }
  0xae   :  { %300 = dma.done.wait [#allocation4], 64  }
  0xaf   :  { %301 = vsyncadd [#allocation4], 4294967232 }
  0xb0   :  { %186 = vsyncpa [#allocation3], 1 }
  0xb1   :  { %187 = vsyncpa [#allocation6], 1 }
  0xb2   :  { %188 = vsyncpa [#allocation4], 1 }

</bundles_post_ra>
